<compile_context>
chip_gen: v5e
topology: v5e:2x2
jax: 0.10.0
libtpu: 0.0.40
codegen_flags: <defaults>
</compile_context>

<pallas_src>
import functools

import jax
import jax.numpy as jnp
from jax.experimental import pallas as pl
from jax.experimental.pallas import tpu as pltpu


_INV_SQRT2 = 0.7071067811865476


def _ffn_kernel(x_ref, w1v_ref, w1g_ref, b1v_ref, b1g_ref, w2_ref, b2_ref,
                o_ref, acc_ref):
    """One (row-tile, hidden-tile) step of Linear -> GEGLU -> Linear."""
    h_idx = pl.program_id(1)
    n_h = pl.num_programs(1)

    @pl.when(h_idx == 0)
    def _():
        acc_ref[...] = jnp.zeros_like(acc_ref)

    x = x_ref[...]  # native dtype (bf16 stays bf16 -> full MXU rate)

    # First linear, split into value / gate halves; f32 accumulation only.
    a = jnp.dot(x, w1v_ref[...], preferred_element_type=jnp.float32)
    a = a + b1v_ref[...].astype(jnp.float32)
    g = jnp.dot(x, w1g_ref[...], preferred_element_type=jnp.float32)
    g = g + b1g_ref[...].astype(jnp.float32)

    # Exact (erf-based) GELU in f32, matching torch.nn.functional.gelu default.
    gelu_g = 0.5 * g * (1.0 + jax.lax.erf(g * jnp.float32(_INV_SQRT2)))
    ge = (a * gelu_g).astype(w2_ref.dtype)  # back to native dtype for the MXU

    # Second linear: accumulate the partial product over the hidden tiles.
    acc_ref[...] += jnp.dot(ge, w2_ref[...], preferred_element_type=jnp.float32)

    @pl.when(h_idx == n_h - 1)
    def _():
        o_ref[...] = (acc_ref[...] + b2_ref[...].astype(jnp.float32)).astype(o_ref.dtype)


def _round_up(x, m):
    return ((x + m - 1) // m) * m


@functools.partial(jax.jit, static_argnames=("tile_m", "tile_h"))
def feed_forward(x, w1, b1, w2, b2, *, tile_m=256, tile_h=512):
    """x: (B, N, D). Weights in (in, out) layout (already transposed vs. torch)."""
    assert tile_m % 8 == 0
    B, N, D = x.shape
    two_h = w1.shape[1]
    H = w2.shape[0]
    assert two_h == 2 * H

    M = B * N
    # Shrink the row tile for tiny inputs, otherwise pad M up to a tile multiple.
    tile_m_eff = min(tile_m, _round_up(M, 8))
    M_pad = _round_up(M, tile_m_eff)

    # Hidden-dim tiling (reduction axis of the second matmul).
    if H % tile_h == 0 and tile_h % 128 == 0:
        tile_h_eff = tile_h
    else:
        tile_h_eff = H  # single full block over the hidden dim

    x2d = x.reshape(M, D)
    if M_pad != M:
        x2d = jnp.pad(x2d, ((0, M_pad - M), (0, 0)))

    # Split W1/b1 into value and gate halves (done once, outside the kernel).
    w1v, w1g = w1[:, :H], w1[:, H:]
    b1v = b1[:H].reshape(1, H)
    b1g = b1[H:].reshape(1, H)
    b2_2d = b2.reshape(1, D)

    grid = (M_pad // tile_m_eff, H // tile_h_eff)

    out2d = pl.pallas_call(
        _ffn_kernel,
        out_shape=jax.ShapeDtypeStruct((M_pad, D), x.dtype),
        grid_spec=pltpu.PrefetchScalarGridSpec(
            num_scalar_prefetch=0,
            grid=grid,
            in_specs=[
                pl.BlockSpec((tile_m_eff, D), lambda i, h: (i, 0)),   # x rows
                pl.BlockSpec((D, tile_h_eff), lambda i, h: (0, h)),   # W1 value half
                pl.BlockSpec((D, tile_h_eff), lambda i, h: (0, h)),   # W1 gate half
                pl.BlockSpec((1, tile_h_eff), lambda i, h: (0, h)),   # b1 value half
                pl.BlockSpec((1, tile_h_eff), lambda i, h: (0, h)),   # b1 gate half
                pl.BlockSpec((tile_h_eff, D), lambda i, h: (h, 0)),   # W2
                pl.BlockSpec((1, D), lambda i, h: (0, 0)),            # b2
            ],
            out_specs=pl.BlockSpec((tile_m_eff, D), lambda i, h: (i, 0)),
            scratch_shapes=[pltpu.VMEM((tile_m_eff, D), jnp.float32)],
        ),
        compiler_params=pltpu.CompilerParams(
            dimension_semantics=("parallel", "arbitrary"),
            vmem_limit_bytes=64 * 1024 * 1024,
        ),
    )(x2d, w1v, w1g, b1v, b1g, w2, b2_2d)

    return out2d[:M].reshape(B, N, D)


def init_feed_forward_params(key, dim, mult=4, dtype=jnp.float32):
    """PyTorch-Linear-style uniform(-1/sqrt(in), 1/sqrt(in)) init.

    Weights stored as (in_features, out_features) so the kernel computes
    x @ W + b, semantically identical to torch's x @ W_t.T + b.
    """
    hidden = dim * mult
    k1, k2, k3, k4 = jax.random.split(key, 4)
    bound1 = 1.0 / jnp.sqrt(dim)
    bound2 = 1.0 / jnp.sqrt(hidden)
    w1 = jax.random.uniform(k1, (dim, 2 * hidden), dtype, -bound1, bound1)
    b1 = jax.random.uniform(k2, (2 * hidden,), dtype, -bound1, bound1)
    w2 = jax.random.uniform(k3, (hidden, dim), dtype, -bound2, bound2)
    b2 = jax.random.uniform(k4, (dim,), dtype, -bound2, bound2)
    return w1, b1, w2, b2


def _reference(x, w1, b1, w2, b2):
    """Pure-JAX reference (f32) for correctness check."""
    xf = x.astype(jnp.float32)
    h = xf @ w1.astype(jnp.float32) + b1.astype(jnp.float32)
    H = w2.shape[0]
    a, g = h[..., :H], h[..., H:]
    ge = a * (0.5 * g * (1.0 + jax.lax.erf(g * _INV_SQRT2)))
    return ge @ w2.astype(jnp.float32) + b2.astype(jnp.float32)


if __name__ == "__main__":
    key = jax.random.PRNGKey(0)
    k_x, k_p, k_x2 = jax.random.split(key, 3)

    B, N, dim, mult = 2, 8, 32, 4        # small shapes consistent with FeedForward(dim=32)
    x = jax.random.normal(k_x, (B, N, dim), jnp.float32)
    w1, b1, w2, b2 = init_feed_forward_params(k_p, dim, mult)

    out = feed_forward(x, w1, b1, w2, b2)
    out = jax.block_until_ready(out)

    ref = _reference(x, w1, b1, w2, b2)
    assert out.shape == (B, N, dim)
    assert jnp.allclose(out, ref, atol=1e-5, rtol=1e-5), "mismatch vs reference"

    # Robustness check: row count not a multiple of the tile (exercises padding).
    x_odd = jax.random.normal(k_x2, (2, 7, dim), jnp.float32)
    out_odd = jax.block_until_ready(feed_forward(x_odd, w1, b1, w2, b2))
    ref_odd = _reference(x_odd, w1, b1, w2, b2)
    assert jnp.allclose(out_odd, ref_odd, atol=1e-5, rtol=1e-5), "mismatch (padded rows)"

    print("KERNEL_OK")
</pallas_src>

<mosaic_0001>
module attributes {stable_mosaic.version = 11 : i64} {
  func.func @_ffn_kernel(%arg0: i32, %arg1: i32, %arg2: memref<16x32xf32, #tpu.memory_space<vmem>>, %arg3: memref<32x128xf32, #tpu.memory_space<vmem>>, %arg4: memref<32x128xf32, #tpu.memory_space<vmem>>, %arg5: memref<1x128xf32, #tpu.memory_space<vmem>>, %arg6: memref<1x128xf32, #tpu.memory_space<vmem>>, %arg7: memref<128x32xf32, #tpu.memory_space<vmem>>, %arg8: memref<1x32xf32, #tpu.memory_space<vmem>>, %arg9: memref<16x32xf32, #tpu.memory_space<vmem>>, %arg10: memref<16x32xf32, #tpu.memory_space<vmem>>) attributes {dimension_semantics = [#tpu.dimension_semantics<parallel>, #tpu.dimension_semantics<arbitrary>], iteration_bounds = array<i64: 1, 1>, scalar_prefetch = 0 : i64, scratch_operands = 1 : i64, tpu.core_type = #tpu.core_type<tc>, window_params = [{transform_indices = @transform_0, window_bounds = array<i64: 16, 32>}, {transform_indices = @transform_1, window_bounds = array<i64: 32, 128>}, {transform_indices = @transform_2, window_bounds = array<i64: 32, 128>}, {transform_indices = @transform_3, window_bounds = array<i64: 1, 128>}, {transform_indices = @transform_4, window_bounds = array<i64: 1, 128>}, {transform_indices = @transform_5, window_bounds = array<i64: 128, 32>}, {pipeline_mode = #tpu.pipeline_mode<synchronous>, transform_indices = @transform_6, window_bounds = array<i64: 1, 32>}, {transform_indices = @transform_7, window_bounds = array<i64: 16, 32>}]} {
    %c0_i32 = arith.constant 0 : i32
    %0 = arith.cmpi eq, %arg1, %c0_i32 : i32
    %1 = arith.extui %0 : i1 to i32
    %c0_i32_0 = arith.constant 0 : i32
    %2 = arith.cmpi ne, %1, %c0_i32_0 : i32
    scf.if %2 {
      %cst_23 = arith.constant 0.000000e+00 : f32
      %31 = vector.broadcast %cst_23 : f32 to vector<16x32xf32>
      %c0_24 = arith.constant 0 : index
      %c0_25 = arith.constant 0 : index
      %32 = vector.load %arg10[%c0_24, %c0_25] : memref<16x32xf32, #tpu.memory_space<vmem>>, vector<16x32xf32>
      tpu.vector_store %arg10[%c0_24, %c0_25], %31 {strides = array<i32>} : memref<16x32xf32, #tpu.memory_space<vmem>>, vector<16x32xf32>,
    } else {
    }
    %c0 = arith.constant 0 : index
    %c0_1 = arith.constant 0 : index
    %3 = vector.load %arg2[%c0, %c0_1] : memref<16x32xf32, #tpu.memory_space<vmem>>, vector<16x32xf32>
    %c0_2 = arith.constant 0 : index
    %c0_3 = arith.constant 0 : index
    %4 = vector.load %arg3[%c0_2, %c0_3] : memref<32x128xf32, #tpu.memory_space<vmem>>, vector<32x128xf32>
    %cst = arith.constant dense<0.000000e+00> : vector<16x128xf32>
    %5 = tpu.matmul %3, %4, %cst {dimension_numbers = #tpu.dot_dimension_numbers<[1], [0], [0], [1], [0, 0, 1, 1], [], []>} : vector<16x32xf32>, vector<32x128xf32>, vector<16x128xf32> -> vector<16x128xf32>
    %c0_4 = arith.constant 0 : index
    %c0_5 = arith.constant 0 : index
    %6 = vector.load %arg5[%c0_4, %c0_5] : memref<1x128xf32, #tpu.memory_space<vmem>>, vector<1x128xf32>
    %7 = vector.broadcast %6 : vector<1x128xf32> to vector<16x128xf32>
    %8 = arith.addf %5, %7 : vector<16x128xf32>
    %c0_6 = arith.constant 0 : index
    %c0_7 = arith.constant 0 : index
    %9 = vector.load %arg4[%c0_6, %c0_7] : memref<32x128xf32, #tpu.memory_space<vmem>>, vector<32x128xf32>
    %cst_8 = arith.constant dense<0.000000e+00> : vector<16x128xf32>
    %10 = tpu.matmul %3, %9, %cst_8 {dimension_numbers = #tpu.dot_dimension_numbers<[1], [0], [0], [1], [0, 0, 1, 1], [], []>} : vector<16x32xf32>, vector<32x128xf32>, vector<16x128xf32> -> vector<16x128xf32>
    %c0_9 = arith.constant 0 : index
    %c0_10 = arith.constant 0 : index
    %11 = vector.load %arg6[%c0_9, %c0_10] : memref<1x128xf32, #tpu.memory_space<vmem>>, vector<1x128xf32>
    %12 = vector.broadcast %11 : vector<1x128xf32> to vector<16x128xf32>
    %13 = arith.addf %10, %12 : vector<16x128xf32>
    %cst_11 = arith.constant 5.000000e-01 : f32
    %14 = vector.broadcast %cst_11 : f32 to vector<16x128xf32>
    %15 = arith.mulf %14, %13 : vector<16x128xf32>
    %cst_12 = arith.constant 0.707106769 : f32
    %16 = vector.broadcast %cst_12 : f32 to vector<16x128xf32>
    %17 = arith.mulf %13, %16 : vector<16x128xf32>
    %18 = math.erf %17 : vector<16x128xf32>
    %cst_13 = arith.constant 1.000000e+00 : f32
    %19 = vector.broadcast %cst_13 : f32 to vector<16x128xf32>
    %20 = arith.addf %19, %18 : vector<16x128xf32>
    %21 = arith.mulf %15, %20 : vector<16x128xf32>
    %22 = arith.mulf %8, %21 : vector<16x128xf32>
    %c0_14 = arith.constant 0 : index
    %c0_15 = arith.constant 0 : index
    %23 = vector.load %arg10[%c0_14, %c0_15] : memref<16x32xf32, #tpu.memory_space<vmem>>, vector<16x32xf32>
    %c0_16 = arith.constant 0 : index
    %c0_17 = arith.constant 0 : index
    %24 = vector.load %arg7[%c0_16, %c0_17] : memref<128x32xf32, #tpu.memory_space<vmem>>, vector<128x32xf32>
    %cst_18 = arith.constant dense<0.000000e+00> : vector<16x32xf32>
    %25 = tpu.matmul %22, %24, %cst_18 {dimension_numbers = #tpu.dot_dimension_numbers<[1], [0], [0], [1], [0, 0, 1, 1], [], []>} : vector<16x128xf32>, vector<128x32xf32>, vector<16x32xf32> -> vector<16x32xf32>
    %26 = arith.addf %23, %25 : vector<16x32xf32>
    %c0_19 = arith.constant 0 : index
    %c0_20 = arith.constant 0 : index
    %27 = vector.load %arg10[%c0_19, %c0_20] : memref<16x32xf32, #tpu.memory_space<vmem>>, vector<16x32xf32>
    tpu.vector_store %arg10[%c0_19, %c0_20], %26 {strides = array<i32>} : memref<16x32xf32, #tpu.memory_space<vmem>>, vector<16x32xf32>,
    %c0_i32_21 = arith.constant 0 : i32
    %28 = arith.cmpi eq, %arg1, %c0_i32_21 : i32
    %29 = arith.extui %28 : i1 to i32
    %c0_i32_22 = arith.constant 0 : i32
    %30 = arith.cmpi ne, %29, %c0_i32_22 : i32
    scf.if %30 {
      %c0_23 = arith.constant 0 : index
      %c0_24 = arith.constant 0 : index
      %31 = vector.load %arg10[%c0_23, %c0_24] : memref<16x32xf32, #tpu.memory_space<vmem>>, vector<16x32xf32>
      %c0_25 = arith.constant 0 : index
      %c0_26 = arith.constant 0 : index
      %32 = vector.load %arg8[%c0_25, %c0_26] : memref<1x32xf32, #tpu.memory_space<vmem>>, vector<1x32xf32>
      %33 = vector.broadcast %32 : vector<1x32xf32> to vector<16x32xf32>
      %34 = arith.addf %31, %33 : vector<16x32xf32>
      %c0_27 = arith.constant 0 : index
      %c0_28 = arith.constant 0 : index
      %35 = vector.load %arg9[%c0_27, %c0_28] : memref<16x32xf32, #tpu.memory_space<vmem>>, vector<16x32xf32>
      tpu.vector_store %arg9[%c0_27, %c0_28], %34 {strides = array<i32>} : memref<16x32xf32, #tpu.memory_space<vmem>>, vector<16x32xf32>,
    } else {
    }
    return
  }
  func.func @transform_0(%arg0: i32, %arg1: i32) -> (i32, i32) {
    %c0_i32 = arith.constant 0 : i32
    %c0_i32_0 = arith.constant 0 : i32
    return %arg0, %c0_i32 : i32, i32
  }
  func.func @transform_1(%arg0: i32, %arg1: i32) -> (i32, i32) {
    %c0_i32 = arith.constant 0 : i32
    %c0_i32_0 = arith.constant 0 : i32
    return %c0_i32, %arg1 : i32, i32
  }
  func.func @transform_2(%arg0: i32, %arg1: i32) -> (i32, i32) {
    %c0_i32 = arith.constant 0 : i32
    %c0_i32_0 = arith.constant 0 : i32
    return %c0_i32, %arg1 : i32, i32
  }
  func.func @transform_3(%arg0: i32, %arg1: i32) -> (i32, i32) {
    %c0_i32 = arith.constant 0 : i32
    %c0_i32_0 = arith.constant 0 : i32
    return %c0_i32, %arg1 : i32, i32
  }
  func.func @transform_4(%arg0: i32, %arg1: i32) -> (i32, i32) {
    %c0_i32 = arith.constant 0 : i32
    %c0_i32_0 = arith.constant 0 : i32
    return %c0_i32, %arg1 : i32, i32
  }
  func.func @transform_5(%arg0: i32, %arg1: i32) -> (i32, i32) {
    %c0_i32 = arith.constant 0 : i32
    %c0_i32_0 = arith.constant 0 : i32
    return %arg1, %c0_i32 : i32, i32
  }
  func.func @transform_6(%arg0: i32, %arg1: i32) -> (i32, i32) {
    %c0_i32 = arith.constant 0 : i32
    %c0_i32_0 = arith.constant 0 : i32
    %c0_i32_1 = arith.constant 0 : i32
    return %c0_i32, %c0_i32_0 : i32, i32
  }
  func.func @transform_7(%arg0: i32, %arg1: i32) -> (i32, i32) {
    %c0_i32 = arith.constant 0 : i32
    %c0_i32_0 = arith.constant 0 : i32
    return %arg0, %c0_i32 : i32, i32
  }
}

</mosaic_0001>

<bundles_post_ra>
// kernel: feed_forward.1
= control target key start
LH: loop header
LB: loop body
LE: loop exit
PB: predicated region body
PF: predicated region fallthrough
CT: control target
= control target key end

     0   :  { %s504_s0 = inlined_call_operand.vmem [shape: f32[16,32], index: 0, kind: input, shape index: {}]   ;;  %s505_s1 = inlined_call_operand.vmem [shape: f32[32,128], index: 1, kind: input, shape index: {}]   ;;  %s506_s2 = inlined_call_operand.vmem [shape: f32[32,128], index: 2, kind: input, shape index: {}]   ;;  %s507_s3 = inlined_call_operand.vmem [shape: f32[1,128], index: 3, kind: input, shape index: {}]   ;;  %s508_s4 = inlined_call_operand.vmem [shape: f32[1,128], index: 4, kind: input, shape index: {}]   ;;  %s509_s5 = inlined_call_operand.vmem [shape: f32[128,32], index: 5, kind: input, shape index: {}]   ;;  %s510_s6 = inlined_call_operand.vmem [shape: f32[1,32], index: 6, kind: input, shape index: {}]   ;;  %s511_s7 = inlined_call_operand.hbm [shape: f32[16,32], index: 7, kind: output, shape index: {}]  }
   0x1   :  { %v77_v0 = vld [vmem:[%s506_s2 + $0x18] sm:$0xff]  ;;  %v76_v1 = vld [vmem:[%s506_s2 + $0x10] sm:$0xff]  ;;  %v75_v2 = vld [vmem:[%s506_s2 + $0x8] sm:$0xff] }
   0x2   :  { %94 = vmatpush.msra.mxu1 %v77_v0  ;;  %v39_v3 = vld [vmem:[%s505_s1 + $0x18] sm:$0xff]  ;;  %v38_v4 = vld [vmem:[%s505_s1 + $0x10] sm:$0xff]  ;;  %v74_v5 = vld [vmem:[%s506_s2] sm:$0xff] }
   0x3   :  { %63 = vmatpush.msra.mxu0 %v39_v3  ;;  %v37_v6 = vld [vmem:[%s505_s1 + $0x8] sm:$0xff] }
   0x4   :  { %95 = vmatpush.msra.mxu1 %v76_v1 }
   0x5   :  { %12 = vsyncpa [#allocation4], 0  ;;  %vm31_vm0 = vcmask 261120   ;;  %v34_v7 = vld [vmem:[%s504_s0] sm:$0xff]  ;;  %64 = vmatpush.msra.mxu0 %v38_v4  ;;  %v35_v9 = vld [vmem:[%s504_s0 + $0x8] sm:$0xff]  ;;  %s331_s27 = smov [#allocation3]  }
   0x6   :  { %96 = vmatpush.msra.mxu1 %v75_v2  ;;  %v36_v8 = vld [vmem:[%s505_s1] sm:$0xff]  ;;  %v212_v10 = vld [vmem:[%s509_s5 + $0x78] sm:$0xff]  ;;  %v211_v11 = vld [vmem:[%s509_s5 + $0x70] sm:$0xff]  ;;  %s257_s28 = sshll.u32 %s331_s27, 4  ;;  %s259_s8 = sshll.u32 %s511_s7, 4  ;;  %s258_s28 = int_to_ptr.vmem [resolvable:$true] %s257_s28  ;;  %s260_s8 = int_to_ptr.hbm [resolvable:$true] %s259_s8 }
   0x7   :  { %65 = vmatpush.msra.mxu0 %v37_v6  ;;  %213 = vmatpush.msra.mxu2 %v212_v10  ;;  %v210_v12 = vld [vmem:[%s509_s5 + $0x68] sm:$0xff]  ;;  %v297_v13 = vld [vmem:[%s508_s4] ss:$0 sm:$0xff]  ;;  %v208_v16 = vld [vmem:[%s509_s5 + $0x58] sm:$0xff]  ;;  %v330_v6 = vmov 0.0   ;;  %s333_s4 = smov 8  }
   0x8   :  { %97 = vmatpush.msra.mxu1 %v74_v5  ;;  %277 = vmatpush.msra.mxu3 %v212_v10  ;;  %v209_v14 = vld [vmem:[%s509_s5 + $0x60] sm:$0xff]  ;;  %v207_v18 = vld [vmem:[%s509_s5 + $0x50] sm:$0xff]  ;;  %v206_v20 = vld [vmem:[%s509_s5 + $0x48] sm:$0xff]  ;;  %32 = vst.msk [vmem:[#allocation2] sm:$0xff] %vm31_vm0, %v330_v6 }
   0x9   :  { %273 = vmatmul.msk.f32.vlgmr.msra.gmra.mxu1 %vm31_vm0, %v34_v7  ;;  %66 = vmatpush.msra.mxu0 %v36_v8  ;;  %v205_v22 = vld [vmem:[%s509_s5 + $0x40] sm:$0xff]  ;;  %v204_v23 = vld [vmem:[%s509_s5 + $0x38] sm:$0xff]  ;;  %v203_v26 = vld [vmem:[%s509_s5 + $0x30] sm:$0xff]  ;;  %33 = vst.msk [vmem:[#allocation2 + $0x8] sm:$0xff] %vm31_vm0, %v330_v6 }
   0xa   :  { %271 = vmatmul.msk.f32.vlgmr.msra.gmra.mxu0 %vm31_vm0, %v34_v7  ;;  %214 = vmatpush.msra.mxu2 %v211_v11  ;;  %v202_v30 = vld [vmem:[%s509_s5 + $0x28] sm:$0xff]  ;;  %v201_v33 = vld [vmem:[%s509_s5 + $0x20] sm:$0xff]  ;;  %v200_v37 = vld [vmem:[%s509_s5 + $0x18] sm:$0xff] }
   0xb   :  { %278 = vmatpush.msra.mxu3 %v211_v11  ;;  %v199_v40 = vld [vmem:[%s509_s5 + $0x10] sm:$0xff]  ;;  %v198_v45 = vld [vmem:[%s509_s5 + $0x8] sm:$0xff]  ;;  %v197_v49 = vld [vmem:[%s509_s5] sm:$0xff] }
   0xc   :  { %215 = vmatpush.msra.mxu2 %v210_v12 }
   0xd   :  { %279 = vmatpush.msra.mxu3 %v210_v12 }
   0xe   :  { %216 = vmatpush.msra.mxu2 %v209_v14 }
   0xf   :  { %280 = vmatpush.msra.mxu3 %v209_v14 }
  0x10   :  { %217 = vmatpush.msra.mxu2 %v208_v16 }
  0x11   :  { %274 = vmatmul.msk.f32.gmra.mxu1 %vm31_vm0, %v35_v9  ;;  %281 = vmatpush.msra.mxu3 %v208_v16 }
  0x12   :  { %272 = vmatmul.msk.f32.gmra.mxu0 %vm31_vm0, %v35_v9  ;;  %218 = vmatpush.msra.mxu2 %v207_v18 }
  0x13   :  { %282 = vmatpush.msra.mxu3 %v207_v18 }
  0x14   :  { %219 = vmatpush.msra.mxu2 %v206_v20 }
  0x15   :  { %283 = vmatpush.msra.mxu3 %v206_v20 }
  0x16   :  { %220 = vmatpush.msra.mxu2 %v205_v22 }
  0x17   :  { %284 = vmatpush.msra.mxu3 %v205_v22 }
  0x18   :  { %221 = vmatpush.msra.mxu2 %v204_v23 }
  0x19   :  { %285 = vmatpush.msra.mxu3 %v204_v23 }
  0x1a   :  { %222 = vmatpush.msra.mxu2 %v203_v26 }
  0x1b   :  { %286 = vmatpush.msra.mxu3 %v203_v26 }
  0x1c   :  { %223 = vmatpush.msra.mxu2 %v202_v30 }
  0x1d   :  { %287 = vmatpush.msra.mxu3 %v202_v30 }
  0x1e   :  { %224 = vmatpush.msra.mxu2 %v201_v33 }
  0x1f   :  { %288 = vmatpush.msra.mxu3 %v201_v33 }
  0x20   :  { %225 = vmatpush.msra.mxu2 %v200_v37 }
  0x21   :  { %289 = vmatpush.msra.mxu3 %v200_v37 }
  0x22   :  { %226 = vmatpush.msra.mxu2 %v199_v40 }
  0x23   :  { %290 = vmatpush.msra.mxu3 %v199_v40 }
  0x24   :  { %227 = vmatpush.msra.mxu2 %v198_v45 }
  0x25   :  { %291 = vmatpush.msra.mxu3 %v198_v45 }
  0x26   :  { %228 = vmatpush.msra.mxu2 %v197_v49 }
  0x27   :  { %292 = vmatpush.msra.mxu3 %v197_v49 }
  0x86   :  { %v99_v15 = vpop.f32.mrf.mxu1 }
  0x87   :  { %v426_v17 = vadd.f32 %v297_v13, %v99_v15 }
  0x89   :  { %v432_v19 = vmul.f32 0.70710677, %v426_v17 }
  0x8b   :  { %v109_v21 = vmul.f32 %v432_v19, %v432_v19 }
  0x8d   :  { %v445_v24 = vmin.f32 %v109_v21, 16.0 }
  0x8e   :  { %v102_v25 = vpop.f32.mrf.mxu1 }
  0x8f   :  { %v111_v27 = vmul.f32 2.1237322e-06, %v445_v24  ;;  %v451_v28 = vadd.f32 %v297_v13, %v102_v25  ;;  %v122_v29 = vmul.f32 3.8918573e-05, %v445_v24 }
  0x91   :  { %v112_v31 = vadd.f32 0.00028619796, %v111_v27  ;;  %v458_v32 = vmul.f32 0.70710677, %v451_v28  ;;  %v123_v34 = vadd.f32 0.001143296, %v122_v29  ;;  %v68_v27 = vpop.f32.mrf.mxu0 }
  0x93   :  { %v113_v35 = vmul.f32 %v112_v31, %v445_v24  ;;  %v149_v36 = vmul.f32 %v458_v32, %v458_v32  ;;  %v124_v38 = vmul.f32 %v123_v34, %v445_v24  ;;  %v298_v31 = vld [vmem:[%s507_s3] ss:$0 sm:$0xff] }
  0x94   :  { %v69_v40 = vadd.f32 %v298_v31, %v68_v27 }
  0x95   :  { %v150_v39 = vmin.f32 %v149_v36, 16.0  ;;  %v125_v41 = vadd.f32 0.014752088, %v124_v38  ;;  %v114_v42 = vadd.f32 0.0036580483, %v113_v35 }
  0x97   :  { %v151_v43 = vmul.f32 2.1237322e-06, %v150_v39  ;;  %v162_v44 = vmul.f32 3.8918573e-05, %v150_v39  ;;  %v126_v46 = vmul.f32 %v125_v41, %v445_v24  ;;  %v115_v51 = vmul.f32 %v114_v42, %v445_v24 }
  0x99   :  { %v152_v47 = vadd.f32 0.00028619796, %v151_v43  ;;  %v163_v48 = vadd.f32 0.001143296, %v162_v44  ;;  %v127_v50 = vadd.f32 0.112945676, %v126_v46  ;;  %v71_v49 = vpop.f32.mrf.mxu0 }
  0x9a   :  { %v116_v58 = vadd.f32 0.05243302, %v115_v51  ;;  %v106_v51 = vmul.f32 0.5, %v451_v28 }
  0x9b   :  { %v153_v52 = vmul.f32 %v152_v47, %v150_v39  ;;  %v164_v53 = vmul.f32 %v163_v48, %v150_v39  ;;  %v128_v54 = vmul.f32 %v127_v50, %v445_v24 }
  0x9c   :  { %v117_v0 = vmul.f32 %v116_v58, %v445_v24 }
  0x9d   :  { %v165_v55 = vadd.f32 0.014752088, %v164_v53  ;;  %v154_v56 = vadd.f32 0.0036580483, %v153_v52  ;;  %v129_v57 = vadd.f32 0.4994258, %v128_v54  ;;  %v72_v52 = vadd.f32 %v298_v31, %v71_v49 }
  0x9e   :  { %v118_v4 = vadd.f32 0.18741608, %v117_v0 }
  0x9f   :  { %v166_v59 = vmul.f32 %v165_v55, %v150_v39  ;;  %v130_v60 = vmul.f32 %v129_v57, %v445_v24  ;;  %v155_v62 = vmul.f32 %v154_v56, %v150_v39  ;;  %v195_v55 = vld [vmem:[#allocation2] sm:$0xff] }
  0xa0   :  { %v119_v10 = vmul.f32 %v118_v4, %v445_v24 }
  0xa1   :  { %v167_v61 = vadd.f32 0.112945676, %v166_v59  ;;  %v131_v63 = vadd.f32 1.0, %v130_v60  ;;  %v156_v3 = vadd.f32 0.05243302, %v155_v62 }
  0xa2   :  { %v120_v15 = vadd.f32 1.1283791, %v119_v10  ;;  %v299_v59 = vld [vmem:[%s510_s6] ss:$0 sm:$0xff]  ;;  %s332_s6 = smov 128  }
  0xa3   :  { %v168_v1 = vmul.f32 %v167_v61, %v150_v39  ;;  %300 = vrcp.f32 %v131_v63  ;;  %v157_v9 = vmul.f32 %v156_v3, %v150_v39  ;;  %v143_v14 = vand.u32 2147483648, %v131_v63 }
  0xa4   :  { %v141_v18 = vand.u32 2147483647, %v131_v63  ;;  %vm137_vm2 = vweird.f32 %v131_v63  ;;  %v121_v26 = vmul.f32 %v120_v15, %v432_v19  ;;  %v105_v19 = vmul.f32 0.5, %v426_v17 }
  0xa5   :  { %v169_v2 = vadd.f32 0.4994258, %v168_v1  ;;  %v158_v13 = vadd.f32 0.18741608, %v157_v9  ;;  %v144_v23 = vor.u32 1.1754944e-38, %v143_v14 }
  0xa6   :  { %vm142_vm4 = vcmp.eq.f32.partialorder %v141_v18, 8.507059e+37 }
  0xa7   :  { %v170_v5 = vmul.f32 %v169_v2, %v150_v39  ;;  %v159_v22 = vmul.f32 %v158_v13, %v150_v39 }
  0xa9   :  { %v171_v7 = vadd.f32 1.0, %v170_v5  ;;  %v301_v8 = vpop.eup %300  ;;  %v160_v35 = vadd.f32 1.1283791, %v159_v22 }
  0xaa   :  { %v133_v11 = vmul.f32 %v301_v8, %v131_v63  ;;  %vm138_vm1 = vweird.f32 %v301_v8 }
  0xab   :  { %302 = vrcp.f32 %v171_v7  ;;  %vm139_vm3 = vmor %vm137_vm2, %vm138_vm1  ;;  %v183_v34 = vand.u32 2147483648, %v171_v7  ;;  %v181_v37 = vand.u32 2147483647, %v171_v7  ;;  %vm177_vm6 = vweird.f32 %v171_v7 }
  0xac   :  { %v134_v12 = vsub.f32 1.0, %v133_v11  ;;  %v161_v43 = vmul.f32 %v160_v35, %v458_v32  ;;  %v196_v32 = vld [vmem:[#allocation2 + $0x8] sm:$0xff] }
  0xad   :  { %v184_v42 = vor.u32 1.1754944e-38, %v183_v34  ;;  %vm182_vm8 = vcmp.eq.f32.partialorder %v181_v37, 8.507059e+37 }
  0xae   :  { %v135_v16 = vmul.f32 %v301_v8, %v134_v12 }
  0xb0   :  { %v136_v21 = vadd.f32 %v301_v8, %v135_v16 }
  0xb1   :  { %v303_v20 = vpop.eup %302 }
  0xb2   :  { %v173_v25 = vmul.f32 %v303_v20, %v171_v7  ;;  %v140_v24 = vsel %vm139_vm3, %v301_v8, %v136_v21  ;;  %vm178_vm5 = vweird.f32 %v303_v20 }
  0xb3   :  { %v145_v29 = vsel %vm142_vm4, %v144_v23, %v140_v24  ;;  %vm179_vm7 = vmor %vm177_vm6, %vm178_vm5 }
  0xb4   :  { %v174_v30 = vsub.f32 1.0, %v173_v25  ;;  %v146_v33 = vmul.f32 %v145_v29, %v121_v26 }
  0xb6   :  { %v175_v36 = vmul.f32 %v303_v20, %v174_v30  ;;  %v275_v38 = vclamps-f32 %v146_v33, 1.0 }
  0xb8   :  { %v176_v39 = vadd.f32 %v303_v20, %v175_v36  ;;  %v189_v41 = vadd.f32 1.0, %v275_v38 }
  0xba   :  { %v180_v44 = vsel %vm179_vm7, %v303_v20, %v176_v39  ;;  %v191_v45 = vmul.f32 %v189_v41, %v105_v19 }
  0xbb   :  { %v185_v46 = vsel %vm182_vm8, %v184_v42, %v180_v44 }
  0xbc   :  { %v186_v47 = vmul.f32 %v185_v46, %v161_v43  ;;  %v193_v48 = vmul.f32 %v191_v45, %v69_v40 }
  0xbe   :  { %v276_v50 = vclamps-f32 %v186_v47, 1.0  ;;  %229 = vmatmul.f32.vlgmr.msra.gmra.mxu2 %v193_v48 }
  0xc0   :  { %v190_v53 = vadd.f32 1.0, %v276_v50 }
  0xc2   :  { %v192_v17 = vmul.f32 %v190_v53, %v106_v51 }
  0xc4   :  { %v194_v54 = vmul.f32 %v192_v17, %v72_v52 }
  0xc6   :  { %232 = vmatmul.f32.vlgmr.msra.gmra.mxu3 %v194_v54 }
 0x141   :  { %v230_v56 = vpop.f32.mrf.mxu2 }
 0x142   :  { %v236_v57 = vadd.f32 %v230_v56, %v195_v55 }
 0x144   :  { %238 = vst.msk [vmem:[#allocation2] sm:$0xff] %vm31_vm0, %v236_v57 }
 0x149   :  { %v233_v58 = vpop.f32.mrf.mxu3 }
 0x14a   :  { %v237_v60 = vadd.f32 %v233_v58, %v196_v32 }
 0x14b   :  { %v243_v28 = vld [vmem:[#allocation2] sm:$0xff] }
 0x14c   :  { %239 = vst.msk [vmem:[#allocation2 + $0x8] sm:$0xff] %vm31_vm0, %v237_v60  ;;  %v249_v61 = vadd.f32 %v299_v59, %v243_v28 }
 0x14e   :  { %251 = vst.msk [vmem:[#allocation3] sm:$0xff] %vm31_vm0, %v249_v61 }
 0x153   :  { %v244_v62 = vld [vmem:[#allocation2 + $0x8] sm:$0xff] }
 0x154   :  { %v250_v63 = vadd.f32 %v299_v59, %v244_v62 }
 0x156   :  { %252 = vst.msk [vmem:[#allocation3 + $0x8] sm:$0xff] %vm31_vm0, %v250_v63 }
 0x157   :  { %265 = dma.vmem_to_hbm [thread:$0]  %s258_s28, 256, %s260_s8, [#allocation4], %s332_s6, %s332_s6, %s333_s4  }
 0x158   :  { %328 = dma.done.wait [#allocation4], 256  }
 0x159   :  { %329 = vsyncadd [#allocation4], 4294967040 }
 0x15a   :  { %270 = vsyncpa [#allocation4], 1 }

</bundles_post_ra>
